<compile_context>
chip_gen: v5e
topology: v5e:2x2
jax: 0.10.0
libtpu: 0.0.40
codegen_flags: <defaults>
</compile_context>

<pallas_src>
import functools

import jax
import jax.numpy as jnp
from jax.experimental import pallas as pl
from jax.experimental.pallas import tpu as pltpu


def _gffnet_kernel(x_ref, w1_ref, b1_ref, w2_ref, b2_ref, mask_ref, o_ref,
                   stacked_ref, *, width, compute_dtype):
    # x_ref      : (C_in, L)     L = batch_block*H*W; channels on sublanes, batch*pixels on lanes
    # w1_ref     : (Ki, C_in)    1x1 conv weight (y1 = w1 @ x), compute_dtype
    # b1_ref     : (Ki, 1)       f32
    # w2_ref     : (Ko, 9*Ki)    3x3 conv weight, taps flattened into the contraction dim
    # b2_ref     : (Ko, 1)       f32
    # mask_ref   : (9, L)        per-tap zero-padding validity mask (broadcast over Ki in-kernel)
    # o_ref      : (Ko, L)       lane-dense output (full-width, unmasked stores)
    # stacked_ref: (9*Ki, L)     persistent VMEM scratch holding the im2col operand
    L = x_ref.shape[1]
    Ki = w1_ref.shape[0]

    # ---- conv1: 1x1 conv == per-pixel matmul over channels (lane-dense result) ----
    x = x_ref[...].astype(compute_dtype)
    y1 = jnp.dot(w1_ref[...], x, preferred_element_type=jnp.float32) + b1_ref[...]
    y1 = y1.astype(compute_dtype)                             # (Ki, L)

    # ---- conv2: 3x3 "same" conv as ONE matmul over an im2col stack.
    # Each tap is a lane roll of y1 (XLU); the (9, L) mask, broadcast over Ki sublanes,
    # zeroes pixels whose shifted source lies outside their own image (this also removes
    # cross-image contamination from rolling over the fused batch*pixel axis and the b1
    # contribution on padded taps). Slabs are written straight into the persistent
    # 8-sublane-aligned VMEM scratch.
    t = 0
    for di in (-1, 0, 1):            # tap row    -> spatial offset di
        for dj in (-1, 0, 1):        # tap column -> spatial offset dj
            off = di * width + dj    # flattened-pixel offset
            rolled = y1 if off == 0 else pltpu.roll(y1, (-off) % L, axis=1)
            stacked_ref[t * Ki:(t + 1) * Ki, :] = rolled * mask_ref[t:t + 1, :]
            t += 1

    out = jnp.dot(w2_ref[...], stacked_ref[...],
                  preferred_element_type=jnp.float32) + b2_ref[...]   # (Ko, L)
    o_ref[...] = out.astype(o_ref.dtype)                      # full-lane (unmasked) stores


def gffnet_pallas(x, conv1_weight, conv1_bias, conv2_weight, conv2_bias,
                  *, batch_block=None, use_bf16=False):
    """x: (N, C_in, H, W). Weights/biases in PyTorch nn.Conv2d layouts.
    Returns (N, K, H, W), matching _GFFNet(C_in, K).forward(x) (activation=bn=False)."""
    N, C_in, H, W = x.shape
    Ki = conv1_weight.shape[0]
    Ko = conv2_weight.shape[0]
    HW = H * W
    assert conv1_weight.shape == (Ki, C_in, 1, 1)
    assert conv2_weight.shape == (Ko, Ki, 3, 3)
    assert conv1_bias.shape == (Ki,) and conv2_bias.shape == (Ko,)

    # Auto batch_block: largest divisor of N that still leaves >= 2 grid steps, so both
    # v7x TensorCores get work while v5e/v6e pay only one extra pipeline bubble.
    if batch_block is None:
        batch_block = 1
        for bb in range(1, max(1, N // 2) + 1):
            if N % bb == 0:
                batch_block = bb
    assert N % batch_block == 0, "pad the batch or pass a batch_block dividing N"
    grid_len = N // batch_block
    L = batch_block * HW                      # fused batch*pixel lane extent per step

    compute_dtype = jnp.bfloat16 if use_bf16 else jnp.float32

    # ---- repack parameters into kernel layouts (tiny; constant-folded under jit) ----
    w1_mat = conv1_weight.reshape(Ki, C_in).astype(compute_dtype)            # (Ki, C_in)
    b1_col = conv1_bias.reshape(Ki, 1).astype(jnp.float32)
    # w2_mat[ko, t*Ki + ki] = conv2_weight[ko, ki, di+1, dj+1]  with tap index t = (di+1)*3 + (dj+1)
    w2_mat = jnp.transpose(conv2_weight, (0, 2, 3, 1)).reshape(Ko, 9 * Ki)
    w2_mat = w2_mat.astype(compute_dtype)                                    # (Ko, 9*Ki)
    b2_col = conv2_bias.reshape(Ko, 1).astype(jnp.float32)

    # Per-tap validity masks for ONE image (9, HW), then tiled along lanes for the
    # batch_block images sharing a grid step. Broadcast over Ki happens in-kernel.
    row = jnp.arange(H).reshape(H, 1)
    col = jnp.arange(W).reshape(1, W)
    taps = []
    for di in (-1, 0, 1):
        for dj in (-1, 0, 1):
            valid = ((row + di >= 0) & (row + di < H) &
                     (col + dj >= 0) & (col + dj < W))
            taps.append(valid.reshape(HW))
    mask_img = jnp.stack(taps, axis=0).astype(compute_dtype)                 # (9, HW)
    mask_step = jnp.tile(mask_img, (1, batch_block))                         # (9, L)

    # Channels on sublanes, batch*pixels on lanes (wrapper-side layout plumbing).
    x_2d = jnp.transpose(x.reshape(N, C_in, HW), (1, 0, 2)).reshape(C_in, N * HW)

    kernel = functools.partial(_gffnet_kernel, width=W, compute_dtype=compute_dtype)
    out_2d = pl.pallas_call(
        kernel,
        out_shape=jax.ShapeDtypeStruct((Ko, N * HW), x.dtype),
        grid_spec=pltpu.PrefetchScalarGridSpec(
            num_scalar_prefetch=0,
            grid=(grid_len,),
            in_specs=[
                pl.BlockSpec((C_in, L), lambda n: (0, n)),        # x slab for this step
                pl.BlockSpec((Ki, C_in), lambda n: (0, 0)),       # grid-invariant params
                pl.BlockSpec((Ki, 1), lambda n: (0, 0)),
                pl.BlockSpec((Ko, 9 * Ki), lambda n: (0, 0)),
                pl.BlockSpec((Ko, 1), lambda n: (0, 0)),
                pl.BlockSpec((9, L), lambda n: (0, 0)),           # per-step mask (grid-invariant)
            ],
            out_specs=pl.BlockSpec((Ko, L), lambda n: (0, n)),
            scratch_shapes=[pltpu.VMEM((9 * Ki, L), compute_dtype)],  # persistent im2col slab
        ),
        compiler_params=pltpu.CompilerParams(
            dimension_semantics=("parallel",)),
    )(x_2d, w1_mat, b1_col, w2_mat, b2_col, mask_step)

    # Undo the layout plumbing: (Ko, N*HW) -> (N, Ko, H, W).
    return jnp.transpose(out_2d.reshape(Ko, N, HW), (1, 0, 2)).reshape(N, Ko, H, W)


def gffnet_reference(x, conv1_weight, conv1_bias, conv2_weight, conv2_bias):
    """Pure-JAX reference (lax.conv in NCHW/OIHW, i.e. the torch layouts) for verification."""
    dn = ("NCHW", "OIHW", "NCHW")
    y = jax.lax.conv_general_dilated(x, conv1_weight, (1, 1), "SAME",
                                     dimension_numbers=dn)
    y = y + conv1_bias.reshape(1, -1, 1, 1)
    y = jax.lax.conv_general_dilated(y, conv2_weight, (1, 1), "SAME",
                                     dimension_numbers=dn)
    y = y + conv2_bias.reshape(1, -1, 1, 1)
    return y


if __name__ == "__main__":
    # Small shapes consistent with _GFFNet(C_in=4, K=8) (K_inter defaults to K).
    N, C_in, H, W = 2, 4, 16, 16
    K_inter, K = 8, 8

    key = jax.random.PRNGKey(0)
    kx, kw1, kb1, kw2, kb2 = jax.random.split(key, 5)

    x = jax.random.normal(kx, (N, C_in, H, W), jnp.float32)
    # Parameters in the exact PyTorch nn.Conv2d layouts:
    #   conv1: Conv2d(C_in, K_inter, kernel_size=1) -> weight (K_inter, C_in, 1, 1)
    #   conv2: Conv2d(K_inter, K,    kernel_size=3) -> weight (K, K_inter, 3, 3)
    w1 = jax.random.normal(kw1, (K_inter, C_in, 1, 1), jnp.float32) * 0.2
    b1 = jax.random.normal(kb1, (K_inter,), jnp.float32) * 0.1
    w2 = jax.random.normal(kw2, (K, K_inter, 3, 3), jnp.float32) * 0.1
    b2 = jax.random.normal(kb2, (K,), jnp.float32) * 0.1

    out = jax.block_until_ready(jax.jit(gffnet_pallas)(x, w1, b1, w2, b2))
    ref = jax.block_until_ready(gffnet_reference(x, w1, b1, w2, b2))

    assert out.shape == (N, K, H, W), out.shape
    assert jnp.allclose(out, ref, atol=1e-4, rtol=1e-4), \
        float(jnp.max(jnp.abs(out - ref)))

    print("KERNEL_OK")
</pallas_src>

<mosaic_0001>
module attributes {stable_mosaic.version = 11 : i64} {
  func.func @_gffnet_kernel(%arg0: i32, %arg1: memref<4x256xf32, #tpu.memory_space<vmem>>, %arg2: memref<8x4xf32, #tpu.memory_space<vmem>>, %arg3: memref<8x1xf32, #tpu.memory_space<vmem>>, %arg4: memref<8x72xf32, #tpu.memory_space<vmem>>, %arg5: memref<8x1xf32, #tpu.memory_space<vmem>>, %arg6: memref<9x256xf32, #tpu.memory_space<vmem>>, %arg7: memref<8x256xf32, #tpu.memory_space<vmem>>, %arg8: memref<72x256xf32, #tpu.memory_space<vmem>>) attributes {dimension_semantics = [#tpu.dimension_semantics<parallel>], iteration_bounds = array<i64: 2>, scalar_prefetch = 0 : i64, scratch_operands = 1 : i64, tpu.core_type = #tpu.core_type<tc>, window_params = [{transform_indices = @transform_0, window_bounds = array<i64: 4, 256>}, {pipeline_mode = #tpu.pipeline_mode<synchronous>, transform_indices = @transform_1, window_bounds = array<i64: 8, 4>}, {pipeline_mode = #tpu.pipeline_mode<synchronous>, transform_indices = @transform_2, window_bounds = array<i64: 8, 1>}, {pipeline_mode = #tpu.pipeline_mode<synchronous>, transform_indices = @transform_3, window_bounds = array<i64: 8, 72>}, {pipeline_mode = #tpu.pipeline_mode<synchronous>, transform_indices = @transform_4, window_bounds = array<i64: 8, 1>}, {pipeline_mode = #tpu.pipeline_mode<synchronous>, transform_indices = @transform_5, window_bounds = array<i64: 9, 256>}, {transform_indices = @transform_6, window_bounds = array<i64: 8, 256>}]} {
    %c0 = arith.constant 0 : index
    %c0_0 = arith.constant 0 : index
    %0 = vector.load %arg1[%c0, %c0_0] : memref<4x256xf32, #tpu.memory_space<vmem>>, vector<4x256xf32>
    %c0_1 = arith.constant 0 : index
    %c0_2 = arith.constant 0 : index
    %1 = vector.load %arg2[%c0_1, %c0_2] : memref<8x4xf32, #tpu.memory_space<vmem>>, vector<8x4xf32>
    %cst = arith.constant dense<0.000000e+00> : vector<8x256xf32>
    %2 = tpu.matmul %1, %0, %cst {dimension_numbers = #tpu.dot_dimension_numbers<[1], [0], [0], [1], [0, 0, 1, 1], [], []>} : vector<8x4xf32>, vector<4x256xf32>, vector<8x256xf32> -> vector<8x256xf32>
    %c0_3 = arith.constant 0 : index
    %c0_4 = arith.constant 0 : index
    %3 = vector.load %arg3[%c0_3, %c0_4] : memref<8x1xf32, #tpu.memory_space<vmem>>, vector<8x1xf32>
    %4 = vector.broadcast %3 : vector<8x1xf32> to vector<8x256xf32>
    %5 = arith.addf %2, %4 : vector<8x256xf32>
    %c17_i32 = arith.constant 17 : i32
    %6 = tpu.dynamic_rotate %5 by %c17_i32 dim 1 : vector<8x256xf32>, i32 -> vector<8x256xf32>
    %c0_5 = arith.constant 0 : index
    %c0_6 = arith.constant 0 : index
    %7 = vector.load %arg6[%c0_5, %c0_6] : memref<9x256xf32, #tpu.memory_space<vmem>>, vector<1x256xf32>
    %8 = vector.broadcast %7 : vector<1x256xf32> to vector<8x256xf32>
    %9 = arith.mulf %6, %8 : vector<8x256xf32>
    %c0_7 = arith.constant 0 : index
    %c0_8 = arith.constant 0 : index
    %10 = vector.load %arg8[%c0_7, %c0_8] : memref<72x256xf32, #tpu.memory_space<vmem>>, vector<8x256xf32>
    tpu.vector_store %arg8[%c0_7, %c0_8], %9 {strides = array<i32>} : memref<72x256xf32, #tpu.memory_space<vmem>>, vector<8x256xf32>,
    %c16_i32 = arith.constant 16 : i32
    %11 = tpu.dynamic_rotate %5 by %c16_i32 dim 1 : vector<8x256xf32>, i32 -> vector<8x256xf32>
    %c1 = arith.constant 1 : index
    %c0_9 = arith.constant 0 : index
    %12 = vector.load %arg6[%c1, %c0_9] : memref<9x256xf32, #tpu.memory_space<vmem>>, vector<1x256xf32>
    %13 = vector.broadcast %12 : vector<1x256xf32> to vector<8x256xf32>
    %14 = arith.mulf %11, %13 : vector<8x256xf32>
    %c8 = arith.constant 8 : index
    %c0_10 = arith.constant 0 : index
    %15 = vector.load %arg8[%c8, %c0_10] : memref<72x256xf32, #tpu.memory_space<vmem>>, vector<8x256xf32>
    tpu.vector_store %arg8[%c8, %c0_10], %14 {strides = array<i32>} : memref<72x256xf32, #tpu.memory_space<vmem>>, vector<8x256xf32>,
    %c15_i32 = arith.constant 15 : i32
    %16 = tpu.dynamic_rotate %5 by %c15_i32 dim 1 : vector<8x256xf32>, i32 -> vector<8x256xf32>
    %c2 = arith.constant 2 : index
    %c0_11 = arith.constant 0 : index
    %17 = vector.load %arg6[%c2, %c0_11] : memref<9x256xf32, #tpu.memory_space<vmem>>, vector<1x256xf32>
    %18 = vector.broadcast %17 : vector<1x256xf32> to vector<8x256xf32>
    %19 = arith.mulf %16, %18 : vector<8x256xf32>
    %c16 = arith.constant 16 : index
    %c0_12 = arith.constant 0 : index
    %20 = vector.load %arg8[%c16, %c0_12] : memref<72x256xf32, #tpu.memory_space<vmem>>, vector<8x256xf32>
    tpu.vector_store %arg8[%c16, %c0_12], %19 {strides = array<i32>} : memref<72x256xf32, #tpu.memory_space<vmem>>, vector<8x256xf32>,
    %c1_i32 = arith.constant 1 : i32
    %21 = tpu.dynamic_rotate %5 by %c1_i32 dim 1 : vector<8x256xf32>, i32 -> vector<8x256xf32>
    %c3 = arith.constant 3 : index
    %c0_13 = arith.constant 0 : index
    %22 = vector.load %arg6[%c3, %c0_13] : memref<9x256xf32, #tpu.memory_space<vmem>>, vector<1x256xf32>
    %23 = vector.broadcast %22 : vector<1x256xf32> to vector<8x256xf32>
    %24 = arith.mulf %21, %23 : vector<8x256xf32>
    %c24 = arith.constant 24 : index
    %c0_14 = arith.constant 0 : index
    %25 = vector.load %arg8[%c24, %c0_14] : memref<72x256xf32, #tpu.memory_space<vmem>>, vector<8x256xf32>
    tpu.vector_store %arg8[%c24, %c0_14], %24 {strides = array<i32>} : memref<72x256xf32, #tpu.memory_space<vmem>>, vector<8x256xf32>,
    %c4 = arith.constant 4 : index
    %c0_15 = arith.constant 0 : index
    %26 = vector.load %arg6[%c4, %c0_15] : memref<9x256xf32, #tpu.memory_space<vmem>>, vector<1x256xf32>
    %27 = vector.broadcast %26 : vector<1x256xf32> to vector<8x256xf32>
    %28 = arith.mulf %5, %27 : vector<8x256xf32>
    %c32 = arith.constant 32 : index
    %c0_16 = arith.constant 0 : index
    %29 = vector.load %arg8[%c32, %c0_16] : memref<72x256xf32, #tpu.memory_space<vmem>>, vector<8x256xf32>
    tpu.vector_store %arg8[%c32, %c0_16], %28 {strides = array<i32>} : memref<72x256xf32, #tpu.memory_space<vmem>>, vector<8x256xf32>,
    %c255_i32 = arith.constant 255 : i32
    %30 = tpu.dynamic_rotate %5 by %c255_i32 dim 1 : vector<8x256xf32>, i32 -> vector<8x256xf32>
    %c5 = arith.constant 5 : index
    %c0_17 = arith.constant 0 : index
    %31 = vector.load %arg6[%c5, %c0_17] : memref<9x256xf32, #tpu.memory_space<vmem>>, vector<1x256xf32>
    %32 = vector.broadcast %31 : vector<1x256xf32> to vector<8x256xf32>
    %33 = arith.mulf %30, %32 : vector<8x256xf32>
    %c40 = arith.constant 40 : index
    %c0_18 = arith.constant 0 : index
    %34 = vector.load %arg8[%c40, %c0_18] : memref<72x256xf32, #tpu.memory_space<vmem>>, vector<8x256xf32>
    tpu.vector_store %arg8[%c40, %c0_18], %33 {strides = array<i32>} : memref<72x256xf32, #tpu.memory_space<vmem>>, vector<8x256xf32>,
    %c241_i32 = arith.constant 241 : i32
    %35 = tpu.dynamic_rotate %5 by %c241_i32 dim 1 : vector<8x256xf32>, i32 -> vector<8x256xf32>
    %c6 = arith.constant 6 : index
    %c0_19 = arith.constant 0 : index
    %36 = vector.load %arg6[%c6, %c0_19] : memref<9x256xf32, #tpu.memory_space<vmem>>, vector<1x256xf32>
    %37 = vector.broadcast %36 : vector<1x256xf32> to vector<8x256xf32>
    %38 = arith.mulf %35, %37 : vector<8x256xf32>
    %c48 = arith.constant 48 : index
    %c0_20 = arith.constant 0 : index
    %39 = vector.load %arg8[%c48, %c0_20] : memref<72x256xf32, #tpu.memory_space<vmem>>, vector<8x256xf32>
    tpu.vector_store %arg8[%c48, %c0_20], %38 {strides = array<i32>} : memref<72x256xf32, #tpu.memory_space<vmem>>, vector<8x256xf32>,
    %c240_i32 = arith.constant 240 : i32
    %40 = tpu.dynamic_rotate %5 by %c240_i32 dim 1 : vector<8x256xf32>, i32 -> vector<8x256xf32>
    %c7 = arith.constant 7 : index
    %c0_21 = arith.constant 0 : index
    %41 = vector.load %arg6[%c7, %c0_21] : memref<9x256xf32, #tpu.memory_space<vmem>>, vector<1x256xf32>
    %42 = vector.broadcast %41 : vector<1x256xf32> to vector<8x256xf32>
    %43 = arith.mulf %40, %42 : vector<8x256xf32>
    %c56 = arith.constant 56 : index
    %c0_22 = arith.constant 0 : index
    %44 = vector.load %arg8[%c56, %c0_22] : memref<72x256xf32, #tpu.memory_space<vmem>>, vector<8x256xf32>
    tpu.vector_store %arg8[%c56, %c0_22], %43 {strides = array<i32>} : memref<72x256xf32, #tpu.memory_space<vmem>>, vector<8x256xf32>,
    %c239_i32 = arith.constant 239 : i32
    %45 = tpu.dynamic_rotate %5 by %c239_i32 dim 1 : vector<8x256xf32>, i32 -> vector<8x256xf32>
    %c8_23 = arith.constant 8 : index
    %c0_24 = arith.constant 0 : index
    %46 = vector.load %arg6[%c8_23, %c0_24] : memref<9x256xf32, #tpu.memory_space<vmem>>, vector<1x256xf32>
    %47 = vector.broadcast %46 : vector<1x256xf32> to vector<8x256xf32>
    %48 = arith.mulf %45, %47 : vector<8x256xf32>
    %c64 = arith.constant 64 : index
    %c0_25 = arith.constant 0 : index
    %49 = vector.load %arg8[%c64, %c0_25] : memref<72x256xf32, #tpu.memory_space<vmem>>, vector<8x256xf32>
    tpu.vector_store %arg8[%c64, %c0_25], %48 {strides = array<i32>} : memref<72x256xf32, #tpu.memory_space<vmem>>, vector<8x256xf32>,
    %c0_26 = arith.constant 0 : index
    %c0_27 = arith.constant 0 : index
    %50 = vector.load %arg4[%c0_26, %c0_27] : memref<8x72xf32, #tpu.memory_space<vmem>>, vector<8x72xf32>
    %c0_28 = arith.constant 0 : index
    %c0_29 = arith.constant 0 : index
    %51 = vector.load %arg8[%c0_28, %c0_29] : memref<72x256xf32, #tpu.memory_space<vmem>>, vector<72x256xf32>
    %cst_30 = arith.constant dense<0.000000e+00> : vector<8x256xf32>
    %52 = tpu.matmul %50, %51, %cst_30 {dimension_numbers = #tpu.dot_dimension_numbers<[1], [0], [0], [1], [0, 0, 1, 1], [], []>} : vector<8x72xf32>, vector<72x256xf32>, vector<8x256xf32> -> vector<8x256xf32>
    %c0_31 = arith.constant 0 : index
    %c0_32 = arith.constant 0 : index
    %53 = vector.load %arg5[%c0_31, %c0_32] : memref<8x1xf32, #tpu.memory_space<vmem>>, vector<8x1xf32>
    %54 = vector.broadcast %53 : vector<8x1xf32> to vector<8x256xf32>
    %55 = arith.addf %52, %54 : vector<8x256xf32>
    %c0_33 = arith.constant 0 : index
    %c0_34 = arith.constant 0 : index
    %56 = vector.load %arg7[%c0_33, %c0_34] : memref<8x256xf32, #tpu.memory_space<vmem>>, vector<8x256xf32>
    tpu.vector_store %arg7[%c0_33, %c0_34], %55 {strides = array<i32>} : memref<8x256xf32, #tpu.memory_space<vmem>>, vector<8x256xf32>,
    return
  }
  func.func @transform_0(%arg0: i32) -> (i32, i32) {
    %c0_i32 = arith.constant 0 : i32
    %c0_i32_0 = arith.constant 0 : i32
    return %c0_i32, %arg0 : i32, i32
  }
  func.func @transform_1(%arg0: i32) -> (i32, i32) {
    %c0_i32 = arith.constant 0 : i32
    %c0_i32_0 = arith.constant 0 : i32
    %c0_i32_1 = arith.constant 0 : i32
    return %c0_i32, %c0_i32_0 : i32, i32
  }
  func.func @transform_2(%arg0: i32) -> (i32, i32) {
    %c0_i32 = arith.constant 0 : i32
    %c0_i32_0 = arith.constant 0 : i32
    %c0_i32_1 = arith.constant 0 : i32
    return %c0_i32, %c0_i32_0 : i32, i32
  }
  func.func @transform_3(%arg0: i32) -> (i32, i32) {
    %c0_i32 = arith.constant 0 : i32
    %c0_i32_0 = arith.constant 0 : i32
    %c0_i32_1 = arith.constant 0 : i32
    return %c0_i32, %c0_i32_0 : i32, i32
  }
  func.func @transform_4(%arg0: i32) -> (i32, i32) {
    %c0_i32 = arith.constant 0 : i32
    %c0_i32_0 = arith.constant 0 : i32
    %c0_i32_1 = arith.constant 0 : i32
    return %c0_i32, %c0_i32_0 : i32, i32
  }
  func.func @transform_5(%arg0: i32) -> (i32, i32) {
    %c0_i32 = arith.constant 0 : i32
    %c0_i32_0 = arith.constant 0 : i32
    %c0_i32_1 = arith.constant 0 : i32
    return %c0_i32, %c0_i32_0 : i32, i32
  }
  func.func @transform_6(%arg0: i32) -> (i32, i32) {
    %c0_i32 = arith.constant 0 : i32
    %c0_i32_0 = arith.constant 0 : i32
    return %c0_i32, %arg0 : i32, i32
  }
}

</mosaic_0001>

<bundles_post_ra>
// kernel: gffnet_pallas.1
= control target key start
LH: loop header
LB: loop body
LE: loop exit
PB: predicated region body
PF: predicated region fallthrough
CT: control target
= control target key end

     0   :  { %s695_s21 = smov 0   ;;  %s787_s0 = inlined_call_operand.vmem [shape: f32[4,512], index: 0, kind: input, shape index: {}]   ;;  %s788_s1 = inlined_call_operand.vmem [shape: f32[8,4], index: 1, kind: input, shape index: {}]   ;;  %s789_s2 = inlined_call_operand.vmem [shape: f32[8,1], index: 2, kind: input, shape index: {}]   ;;  %s790_s3 = inlined_call_operand.vmem [shape: f32[8,72], index: 3, kind: input, shape index: {}]   ;;  %s791_s4 = inlined_call_operand.vmem [shape: f32[8,1], index: 4, kind: input, shape index: {}]   ;;  %s792_s5 = inlined_call_operand.vmem [shape: f32[9,256], index: 5, kind: input, shape index: {}]   ;;  %s793_s6 = inlined_call_operand.vmem [shape: f32[8,512], index: 6, kind: output, shape index: {}]  }
   0x1 LB: > { %s599_s22 = sadd.s32 4294967295, %s649_s21   ;;  %p603_p0 = scmp.ge.s32.totalorder %s649_s21, 1  ;;  %s649_s21 = sphi %s695_s21, %s16_s21  }
   0x2   : > { %p213_p1 = scmp.lt.s32.totalorder %s649_s21, 3 }
   0x4   : > { %p214_p2 = pnand %p603_p0, %p213_p1 }
   0x5   : > { %s604_s23 = sshll.u32 (!%p214_p2), %s599_s22, 1  ;;  %s652_s8 = smov (!%p214_p2), 112  }
   0x6   : > { %217 = sbr.rel (%p214_p2) target bundleno = 447 (0x1bf), region = 44  ;;  %p244_p3 = scmp.lt.s32.totalorder (!%p214_p2), %s604_s23, 3 }
   0x7   : > { %s653_s9 = smov (!%p214_p2), 111   ;;  %s654_s10 = smov (!%p214_p2), 113  }
   0x8   : > { %s655_s11 = smov (!%p214_p2), 127   ;;  %s656_s12 = smov (!%p214_p2), 1  }
   0x9   : > { %s657_s13 = smov (!%p214_p2), 15   ;;  %s658_s14 = smov (!%p214_p2), 16  }
   0xa   : > { %s659_s15 = smov (!%p214_p2), 17  }
   0xb   : > { %v257_v0 = vld [vmem:[%s789_s2] sm:$0xff]  ;;  %v651_v1 = vmov 0   ;;  %s795_s23 = smov (!%p244_p3, %s604_s23), 3  ;;  %vm271_vm0 = vcmask 1043456   ;;  %vm267_vm1 = vcmask 31744   ;;  %v320_v11 = vlaneseq }
   0xc   : > { %641 = vset.pattern.permute.xlu0 %v651_v1  ;;  %642 = vset.pattern.permute.xlu2 %v651_v1  ;;  %s605_s26 = sshll.u32 %s795_s23, 2  ;;  %v256_v3 = vld [vmem:[%s788_s1] sm:$0xff]  ;;  %v619_v14 = vld [vmem:[%s792_s5 + $0x10] ss:$8 sm:$0x3]  ;;  %vm497_vm10 = vcmask 588800  }
   0xd   : > { %260 = vperm.xlu0 %641, %v257_v0   ;;  %s247_s29 = scalar_lea.vmem %s787_s0, %s605_s26  ;;  %v735_v13 = vand.u32 127, %v320_v11  ;;  %v464_v15 = vperm.slane %v619_v14, 0  ;;  %v465_v16 = vperm.slane %v619_v14, 1  ;;  %v618_v24 = vld [vmem:[%s792_s5 + $0x7] ss:$8 sm:$0x3] }
   0xe   : > { %v255_v2 = vld [vmem:[%s247_s29] sm:$0xff]  ;;  %v446_v26 = vperm.slane %v618_v24, 0  ;;  %v447_v27 = vperm.slane %v618_v24, 1  ;;  %s607_s16 = sshll.u32 %s795_s23, 3 }
   0xf   : > { %264 = vst [vmem:[#allocation1] ss:$2 sm:$0xff] %v255_v2  ;;  %vm458_vm2 = vcmp.lt.s32.totalorder %v735_v13, 111  ;;  %v617_v25 = vld [vmem:[%s792_s5 + $0x6] ss:$8 sm:$0x3]  ;;  %s253_s19 = scalar_lea.vmem %s793_s6, %s607_s16 }
  0x10   : > { %vm440_vm3 = vcmp.lt.s32.totalorder %v735_v13, 112  ;;  %vm422_vm4 = vcmp.lt.s32.totalorder %v735_v13, 113  ;;  %v428_v29 = vperm.slane %v617_v25, 0  ;;  %v429_v30 = vperm.slane %v617_v25, 1  ;;  %v491_v43 = vld [vmem:[%s791_s4] sm:$0xff] }
  0x11   : > { %v616_v38 = vld [vmem:[%s792_s5 + $0x5] ss:$8 sm:$0x3]  ;;  %v615_v42 = vld [vmem:[%s792_s5 + $0x4] ss:$8 sm:$0x3] }
  0x12   : > { %vm404_vm5 = vcmp.lt.s32.totalorder %v735_v13, 127  ;;  %v410_v44 = vperm.slane %v616_v38, 0  ;;  %v411_v45 = vperm.slane %v616_v38, 1  ;;  %v392_v47 = vperm.slane %v615_v42, 0 }
  0x13   : > { %v393_v48 = vperm.slane %v615_v42, 1  ;;  %v614_v54 = vld [vmem:[%s792_s5 + $0x3] ss:$8 sm:$0x3]  ;;  %vm375_vm6 = vcmp.lt.s32.totalorder %v735_v13, 1  ;;  %vm357_vm7 = vcmp.lt.s32.totalorder %v735_v13, 15 }
  0x14   : > { %v613_v57 = vld [vmem:[%s792_s5 + $0x2] ss:$8 sm:$0x3]  ;;  %v381_v59 = vperm.slane %v614_v54, 0  ;;  %v382_v60 = vperm.slane %v614_v54, 1  ;;  %vm339_vm8 = vcmp.lt.s32.totalorder %v735_v13, 16 }
  0x15   : > { %v363_v62 = vperm.slane %v613_v57, 0  ;;  %v364_v63 = vperm.slane %v613_v57, 1  ;;  %vm322_vm9 = vcmp.lt.s32.totalorder %v735_v13, 17 }
  0x16   : > { %v265_v4 = vld.sshfl [vmem:[#allocation1] sm:$0xff pattern:$0x75316420]  ;;  %v266_v5 = vld.sshfl [vmem:[#allocation1 + $0x8] sm:$0xff pattern:$0x75316420] }
  0x17   : > { %608 = vmatpush.msk.msra.mxu0 %vm271_vm0, %v265_v4  ;;  %610 = vmatpush.msk.msra.mxu1 %vm271_vm0, %v266_v5 }
  0x18   : > { %609 = vmatmul.msk.f32.vlgmr.msra.gmra.mxu0 %vm267_vm1, %v256_v3  ;;  %611 = vmatmul.msk.f32.vlgmr.msra.gmra.mxu1 %vm267_vm1, %v256_v3 }
  0x7f   : > { %v261_v6 = vpop.permute.xlu0 %260 }
  0x95   : > { %v293_v7 = vpop.f32.mrf.mxu0  ;;  %v313_v8 = vpop.f32.mrf.mxu1 }
  0x96   : > { %v715_v9 = vadd.f32 %v293_v7, %v261_v6  ;;  %v717_v10 = vadd.f32 %v313_v8, %v261_v6  ;;  %v612_v7 = vld [vmem:[%s792_s5 + $0x1] ss:$8 sm:$0x3] }
  0x97   : > { %v346_v11 = vperm.slane %v612_v7, 1 }
  0x98   : > { %438 = vrot.lane.b32.xlu2 %v717_v10, %s652_s8  ;;  %456 = vrot.lane.b32.xlu1 %v717_v10, %s653_s9  ;;  %v396_v55 = vmul.f32 %v392_v47, %v715_v9  ;;  %v397_v56 = vmul.f32 %v393_v48, %v717_v10 }
  0x99   : > { %454 = vrot.lane.b32.xlu0 %v715_v9, %s653_s9 }
  0xa0   : > { %418 = vrot.lane.b32.xlu2 %v715_v9, %s654_s10  ;;  %436 = vrot.lane.b32.xlu1 %v715_v9, %s652_s8 }
  0xa1   : > { %420 = vrot.lane.b32.xlu0 %v717_v10, %s654_s10 }
  0xa8   : > { %402 = vrot.lane.b32.xlu2 %v717_v10, %s655_s11  ;;  %400 = vrot.lane.b32.xlu1 %v715_v9, %s655_s11 }
  0xa9   : > { %371 = vrot.lane.b32.xlu0 %v715_v9, %s656_s12 }
  0xb0   : > { %353 = vrot.lane.b32.xlu2 %v715_v9, %s657_s13  ;;  %373 = vrot.lane.b32.xlu1 %v717_v10, %s656_s12 }
  0xb1   : > { %355 = vrot.lane.b32.xlu0 %v717_v10, %s657_s13 }
  0xb8   : > { %337 = vrot.lane.b32.xlu2 %v717_v10, %s658_s14  ;;  %335 = vrot.lane.b32.xlu1 %v715_v9, %s658_s14 }
  0xb9   : > { %316 = vrot.lane.b32.xlu0 %v715_v9, %s659_s15 }
  0xc0   : > { %318 = vrot.lane.b32.xlu1 %v717_v10, %s659_s15  ;;  %494 = vperm.xlu2 %642, %v491_v43   ;;  %v345_v10 = vperm.slane %v612_v7, 0 }
  0xf2   : > { %v439_v12 = vpop.permute.xlu2 %438 }
  0xfa   : > { %v419_v19 = vpop.permute.xlu2 %418 }
 0x102   : > { %v403_v39 = vpop.permute.xlu2 %402 }
 0x10a   : > { %v457_v17 = vpop.permute.xlu1 %456  ;;  %v354_v58 = vpop.permute.xlu2 %353 }
 0x10b   : > { %v455_v18 = vpop.permute.xlu0 %454 }
 0x10c   : > { %v459_v20 = vsel %vm458_vm2, %v455_v18, %v457_v17  ;;  %v460_v21 = vsel %vm458_vm2, %v457_v17, %v455_v18 }
 0x10d   : > { %v468_v22 = vmul.f32 %v464_v15, %v459_v20  ;;  %v469_v23 = vmul.f32 %v465_v16, %v460_v21 }
 0x10f   : > { %508 = vmatpush.msra.mxu2 %v468_v22  ;;  %528 = vmatpush.msra.mxu3 %v469_v23 }
 0x112   : > { %v437_v28 = vpop.permute.xlu1 %436 }
 0x113   : > { %v441_v31 = vsel %vm440_vm3, %v437_v28, %v439_v12  ;;  %v442_v32 = vsel %vm440_vm3, %v439_v12, %v437_v28  ;;  %v421_v33 = vpop.permute.xlu0 %420  ;;  %v338_v12 = vpop.permute.xlu2 %337  ;;  %v472_v28 = vld [vmem:[%s790_s3] sm:$0xff] }
 0x114   : > { %v423_v34 = vsel %vm422_vm4, %v419_v19, %v421_v33  ;;  %v424_v35 = vsel %vm422_vm4, %v421_v33, %v419_v19  ;;  %v450_v36 = vmul.f32 %v446_v26, %v441_v31  ;;  %v451_v37 = vmul.f32 %v447_v27, %v442_v32  ;;  %v325_v19 = vld [vmem:[%s792_s5] ss:$8 sm:$0x3] }
 0x115   : > { %v432_v40 = vmul.f32 %v428_v29, %v423_v34  ;;  %v433_v41 = vmul.f32 %v429_v30, %v424_v35  ;;  %v327_v20 = vperm.slane %v325_v19, 0  ;;  %v328_v21 = vperm.slane %v325_v19, 1 }
 0x116   : > { %509 = vmatpush.msra.mxu2 %v450_v36  ;;  %529 = vmatpush.msra.mxu3 %v451_v37 }
 0x118   : > { %510 = vmatpush.msra.mxu2 %v432_v40  ;;  %530 = vmatpush.msra.mxu3 %v433_v41 }
 0x11a   : > { %v401_v46 = vpop.permute.xlu1 %400 }
 0x11b   : > { %v405_v49 = vsel %vm404_vm5, %v401_v46, %v403_v39  ;;  %v406_v50 = vsel %vm404_vm5, %v403_v39, %v401_v46  ;;  %v372_v51 = vpop.permute.xlu0 %371  ;;  %v495_v29 = vpop.permute.xlu2 %494 }
 0x11c   : > { %v414_v52 = vmul.f32 %v410_v44, %v405_v49  ;;  %v415_v53 = vmul.f32 %v411_v45, %v406_v50 }
 0x11e   : > { %511 = vmatpush.msra.mxu2 %v414_v52  ;;  %531 = vmatpush.msra.mxu3 %v415_v53 }
 0x120   : > { %512 = vmatpush.msra.mxu2 %v396_v55  ;;  %532 = vmatpush.msra.mxu3 %v397_v56 }
 0x122   : > { %v374_v61 = vpop.permute.xlu1 %373 }
 0x123   : > { %v376_v0 = vsel %vm375_vm6, %v372_v51, %v374_v61  ;;  %v377_v1 = vsel %vm375_vm6, %v374_v61, %v372_v51  ;;  %v356_v2 = vpop.permute.xlu0 %355 }
 0x124   : > { %v358_v3 = vsel %vm357_vm7, %v354_v58, %v356_v2  ;;  %v359_v4 = vsel %vm357_vm7, %v356_v2, %v354_v58  ;;  %v385_v5 = vmul.f32 %v381_v59, %v377_v1  ;;  %v386_v6 = vmul.f32 %v382_v60, %v376_v0 }
 0x125   : > { %v367_v8 = vmul.f32 %v363_v62, %v359_v4  ;;  %v368_v9 = vmul.f32 %v364_v63, %v358_v3 }
 0x126   : > { %513 = vmatpush.msra.mxu2 %v385_v5  ;;  %533 = vmatpush.msra.mxu3 %v386_v6 }
 0x128   : > { %514 = vmatpush.msra.mxu2 %v367_v8  ;;  %534 = vmatpush.msra.mxu3 %v368_v9 }
 0x12a   : > { %v336_v14 = vpop.permute.xlu1 %335 }
 0x12b   : > { %v340_v15 = vsel %vm339_vm8, %v336_v14, %v338_v12  ;;  %v341_v16 = vsel %vm339_vm8, %v338_v12, %v336_v14  ;;  %v317_v22 = vpop.permute.xlu0 %316 }
 0x12c   : > { %v349_v17 = vmul.f32 %v345_v10, %v341_v16  ;;  %v350_v18 = vmul.f32 %v346_v11, %v340_v15 }
 0x12e   : > { %515 = vmatpush.msra.mxu2 %v349_v17  ;;  %535 = vmatpush.msra.mxu3 %v350_v18 }
 0x132   : > { %v319_v23 = vpop.permute.xlu1 %318 }
 0x133   : > { %v323_v24 = vsel %vm322_vm9, %v317_v22, %v319_v23  ;;  %v324_v25 = vsel %vm322_vm9, %v319_v23, %v317_v22 }
 0x134   : > { %v331_v26 = vmul.f32 %v327_v20, %v324_v25  ;;  %v332_v27 = vmul.f32 %v328_v21, %v323_v24 }
 0x136   : > { %516 = vmatpush.msra.mxu2 %v331_v26  ;;  %536 = vmatpush.msra.mxu3 %v332_v27 }
 0x137   : > { %620 = vmatmul.msk.f32.vlgmr.msra.gmra.mxu2 %vm497_vm10, %v472_v28  ;;  %621 = vmatmul.msk.f32.vlgmr.msra.gmra.mxu3 %vm497_vm10, %v472_v28 }
 0x1ba   : > { %v518_v13 = vpop.f32.mrf.mxu2  ;;  %v538_v30 = vpop.f32.mrf.mxu3 }
 0x1bb   : > { %v519_v31 = vadd.f32 %v518_v13, %v495_v29  ;;  %v539_v32 = vadd.f32 %v538_v30, %v495_v29 }
 0x1bd   : > { %541 = vst [vmem:[%s253_s19] sm:$0xff] %v519_v31 }
 0x1be   : > { %542 = vst [vmem:[%s253_s19 + $0x8] sm:$0xff] %v539_v32 }
 0x1bf PF: > { %s16_s21 = sadd.s32 1, %s649_s21  }
 0x1c0   : > { %p13_p4 = scmp.ge.s32.totalorder %s16_s21, 4  }
 0x1c2   :  { %15 = sbr.rel (!%p13_p4) target bundleno = 1 (0x1), region = 82 }

</bundles_post_ra>
